<compile_context>
chip_gen: v7x
topology: tpu7x:2x2x1
jax: 0.10.0
libtpu: 0.0.40
codegen_flags: <defaults>
</compile_context>

<pallas_src>
import jax
import jax.numpy as jnp
from jax.experimental import pallas as pl
from jax.experimental.pallas import tpu as pltpu


def adjrest_kernel(sm_ref, a_ref, o_ref):
    """One (row-tile, col-tile) step of out[h] = sum_k sm[h, k, :, 0] * A[k].

    sm_ref: (H, K, tn, 1) f32 -- precomputed softmax; rows on the sublane axis
                                 so it broadcasts against (tn, tm) A slabs with
                                 no relayout.
    a_ref : (K, tn, tm)        -- adjacency tile stack.
    o_ref : (H, tn, tm)        -- output tile for all hop channels.
    """
    H, K = sm_ref.shape[0], sm_ref.shape[1]

    if o_ref.dtype == jnp.float32:
        # k-outer / h-inner: each A slab loaded once; accumulate directly into
        # the f32 output block (init at k == 0) -- no extra accumulator slab.
        for k in range(K):
            a_k = a_ref[k]
            for h in range(H):
                contrib = a_k * sm_ref[h, k]          # (tn, tm) * (tn, 1)
                if k == 0:
                    o_ref[h] = contrib
                else:
                    o_ref[h] += contrib
    else:
        # Non-f32 output: keep the accumulation in f32 values, cast on store.
        acc = [None] * H
        for k in range(K):
            a_k = a_ref[k].astype(jnp.float32)
            for h in range(H):
                contrib = a_k * sm_ref[h, k]
                acc[h] = contrib if k == 0 else acc[h] + contrib
        for h in range(H):
            o_ref[h] = acc[h].astype(o_ref.dtype)


def _pick_tiles(n):
    """Return (tn, tm): sublane (row) tile and lane (col) tile of the node dim."""
    if n % 128 != 0:
        # Tiny / ragged N: single full-dim tile (always BlockSpec-legal;
        # masked stores for N < 128 are a perf cliff only, not correctness).
        return n, n
    # Lane (col) tile: as wide as divides, multiple of 128 -> dense vst stores.
    tm = next(c for c in (1024, 512, 256, 128) if n % c == 0)
    # Row tile: large, but keep >= 2 row tiles so the parallel grid can shard
    # across v7x's two TensorCores.
    if n % 256 == 0 and n // 256 >= 2:
        tn = 256
    elif n // 128 >= 2:
        tn = 128
    else:
        tn = n
    return tn, tm


def adjrest_forward(A, weight):
    """A: (K, N, N); weight: (H, K, N, 1) -> out: (H, N, N)."""
    K, N, N2 = A.shape
    H, Kw, Nw, one = weight.shape
    assert N == N2 and (Kw, Nw, one) == (K, N, 1)

    # Softmax over the adj axis is O(H*K*N): hoist it out of the per-tile path.
    # Shape stays (H, K, N, 1) so the kernel consumes it in broadcast layout.
    sm = jax.nn.softmax(weight.astype(jnp.float32), axis=1)      # (H, K, N, 1)

    tn, tm = _pick_tiles(N)
    grid = (N // tn, N // tm)

    itemsize = jnp.dtype(A.dtype).itemsize
    cost = pl.CostEstimate(
        flops=2 * H * K * N * N,
        transcendentals=0,
        bytes_accessed=(K + H) * N * N * itemsize + H * K * N * 4,
    )

    return pl.pallas_call(
        adjrest_kernel,
        out_shape=jax.ShapeDtypeStruct((H, N, N), A.dtype),
        grid_spec=pltpu.PrefetchScalarGridSpec(
            num_scalar_prefetch=0,
            grid=grid,
            in_specs=[
                # softmaxed weights depend only on the row tile i, so the
                # pipeline only re-DMAs them when i changes.
                pl.BlockSpec((H, K, tn, 1), lambda i, j: (0, 0, i, 0)),
                pl.BlockSpec((K, tn, tm), lambda i, j: (0, i, j)),
            ],
            out_specs=pl.BlockSpec((H, tn, tm), lambda i, j: (0, i, j)),
        ),
        compiler_params=pltpu.CompilerParams(
            dimension_semantics=("parallel", "parallel"),
            vmem_limit_bytes=48 * 1024 * 1024,
        ),
        cost_estimate=cost,
    )(sm, A)


def adjrest_reference(A, weight):
    # Pure-JAX reference mirroring the PyTorch forward exactly.
    sm = jax.nn.softmax(weight.astype(jnp.float32), axis=1)          # (H, K, N, 1)
    out = jnp.sum(A[None].astype(jnp.float32) * sm, axis=1)          # (H, N, N)
    return out.astype(A.dtype)


if __name__ == "__main__":
    key = jax.random.PRNGKey(0)
    k0, k1, k2 = jax.random.split(key, 3)

    # --- module-faithful small case: adj_nums=4, hop_channel=3, node_num=16 ---
    adj_nums, hop_channel, node_num = 4, 3, 16
    A = jax.random.normal(k0, (adj_nums, node_num, node_num), dtype=jnp.float32)
    # Deterministic parameter init: nn.init.constant_(weight, 0.1); bias is None.
    weight = jnp.full((hop_channel, adj_nums, node_num, 1), 0.1, dtype=jnp.float32)

    out = jax.block_until_ready(adjrest_forward(A, weight))
    ref = adjrest_reference(A, weight)
    assert out.shape == (hop_channel, node_num, node_num)
    assert jnp.allclose(out, ref, atol=2e-5, rtol=2e-5)

    # --- larger case exercising the lane-dense, multi-step tiled path ---
    big_n = 512
    A2 = jax.random.normal(k1, (adj_nums, big_n, big_n), dtype=jnp.float32)
    w2 = 0.1 * jax.random.normal(k2, (hop_channel, adj_nums, big_n, 1), dtype=jnp.float32)
    out2 = jax.block_until_ready(adjrest_forward(A2, w2))
    ref2 = adjrest_reference(A2, w2)
    assert jnp.allclose(out2, ref2, atol=2e-5, rtol=2e-5)

    print("KERNEL_OK")
</pallas_src>

<mosaic_0001>
module attributes {stable_mosaic.version = 11 : i64} {
  func.func @adjrest_kernel(%arg0: i32, %arg1: i32, %arg2: memref<3x4x16x1xf32, #tpu.memory_space<vmem>>, %arg3: memref<4x16x16xf32, #tpu.memory_space<vmem>>, %arg4: memref<3x16x16xf32, #tpu.memory_space<vmem>>) attributes {dimension_semantics = [#tpu.dimension_semantics<parallel>, #tpu.dimension_semantics<parallel>], iteration_bounds = array<i64: 1, 1>, scalar_prefetch = 0 : i64, scratch_operands = 0 : i64, tpu.core_type = #tpu.core_type<tc>, window_params = [{transform_indices = @transform_0, window_bounds = array<i64: 3, 4, 16, 1>}, {transform_indices = @transform_1, window_bounds = array<i64: 4, 16, 16>}, {transform_indices = @transform_2, window_bounds = array<i64: 3, 16, 16>}]} {
    %c0 = arith.constant 0 : index
    %c0_0 = arith.constant 0 : index
    %c0_1 = arith.constant 0 : index
    %0 = vector.load %arg3[%c0, %c0_0, %c0_1] : memref<4x16x16xf32, #tpu.memory_space<vmem>>, vector<1x16x16xf32>
    %1 = vector.shape_cast %0 : vector<1x16x16xf32> to vector<16x16xf32>
    %c0_2 = arith.constant 0 : index
    %c0_3 = arith.constant 0 : index
    %c0_4 = arith.constant 0 : index
    %c0_5 = arith.constant 0 : index
    %2 = vector.load %arg2[%c0_2, %c0_3, %c0_4, %c0_5] : memref<3x4x16x1xf32, #tpu.memory_space<vmem>>, vector<1x1x16x1xf32>
    %3 = vector.shape_cast %2 : vector<1x1x16x1xf32> to vector<16x1xf32>
    %4 = vector.broadcast %3 : vector<16x1xf32> to vector<16x16xf32>
    %5 = arith.mulf %1, %4 : vector<16x16xf32>
    %c0_6 = arith.constant 0 : index
    %c0_7 = arith.constant 0 : index
    %c0_8 = arith.constant 0 : index
    %6 = vector.load %arg4[%c0_6, %c0_7, %c0_8] : memref<3x16x16xf32, #tpu.memory_space<vmem>>, vector<1x16x16xf32>
    %7 = vector.shape_cast %6 : vector<1x16x16xf32> to vector<16x16xf32>
    %8 = vector.shape_cast %5 : vector<16x16xf32> to vector<1x16x16xf32>
    tpu.vector_store %arg4[%c0_6, %c0_7, %c0_8], %8 {strides = array<i32>} : memref<3x16x16xf32, #tpu.memory_space<vmem>>, vector<1x16x16xf32>,
    %c1 = arith.constant 1 : index
    %c0_9 = arith.constant 0 : index
    %c0_10 = arith.constant 0 : index
    %c0_11 = arith.constant 0 : index
    %9 = vector.load %arg2[%c1, %c0_9, %c0_10, %c0_11] : memref<3x4x16x1xf32, #tpu.memory_space<vmem>>, vector<1x1x16x1xf32>
    %10 = vector.shape_cast %9 : vector<1x1x16x1xf32> to vector<16x1xf32>
    %11 = vector.broadcast %10 : vector<16x1xf32> to vector<16x16xf32>
    %12 = arith.mulf %1, %11 : vector<16x16xf32>
    %c1_12 = arith.constant 1 : index
    %c0_13 = arith.constant 0 : index
    %c0_14 = arith.constant 0 : index
    %13 = vector.load %arg4[%c1_12, %c0_13, %c0_14] : memref<3x16x16xf32, #tpu.memory_space<vmem>>, vector<1x16x16xf32>
    %14 = vector.shape_cast %13 : vector<1x16x16xf32> to vector<16x16xf32>
    %15 = vector.shape_cast %12 : vector<16x16xf32> to vector<1x16x16xf32>
    tpu.vector_store %arg4[%c1_12, %c0_13, %c0_14], %15 {strides = array<i32>} : memref<3x16x16xf32, #tpu.memory_space<vmem>>, vector<1x16x16xf32>,
    %c2 = arith.constant 2 : index
    %c0_15 = arith.constant 0 : index
    %c0_16 = arith.constant 0 : index
    %c0_17 = arith.constant 0 : index
    %16 = vector.load %arg2[%c2, %c0_15, %c0_16, %c0_17] : memref<3x4x16x1xf32, #tpu.memory_space<vmem>>, vector<1x1x16x1xf32>
    %17 = vector.shape_cast %16 : vector<1x1x16x1xf32> to vector<16x1xf32>
    %18 = vector.broadcast %17 : vector<16x1xf32> to vector<16x16xf32>
    %19 = arith.mulf %1, %18 : vector<16x16xf32>
    %c2_18 = arith.constant 2 : index
    %c0_19 = arith.constant 0 : index
    %c0_20 = arith.constant 0 : index
    %20 = vector.load %arg4[%c2_18, %c0_19, %c0_20] : memref<3x16x16xf32, #tpu.memory_space<vmem>>, vector<1x16x16xf32>
    %21 = vector.shape_cast %20 : vector<1x16x16xf32> to vector<16x16xf32>
    %22 = vector.shape_cast %19 : vector<16x16xf32> to vector<1x16x16xf32>
    tpu.vector_store %arg4[%c2_18, %c0_19, %c0_20], %22 {strides = array<i32>} : memref<3x16x16xf32, #tpu.memory_space<vmem>>, vector<1x16x16xf32>,
    %c1_21 = arith.constant 1 : index
    %c0_22 = arith.constant 0 : index
    %c0_23 = arith.constant 0 : index
    %23 = vector.load %arg3[%c1_21, %c0_22, %c0_23] : memref<4x16x16xf32, #tpu.memory_space<vmem>>, vector<1x16x16xf32>
    %24 = vector.shape_cast %23 : vector<1x16x16xf32> to vector<16x16xf32>
    %c0_24 = arith.constant 0 : index
    %c1_25 = arith.constant 1 : index
    %c0_26 = arith.constant 0 : index
    %c0_27 = arith.constant 0 : index
    %25 = vector.load %arg2[%c0_24, %c1_25, %c0_26, %c0_27] : memref<3x4x16x1xf32, #tpu.memory_space<vmem>>, vector<1x1x16x1xf32>
    %26 = vector.shape_cast %25 : vector<1x1x16x1xf32> to vector<16x1xf32>
    %27 = vector.broadcast %26 : vector<16x1xf32> to vector<16x16xf32>
    %28 = arith.mulf %24, %27 : vector<16x16xf32>
    %c0_28 = arith.constant 0 : index
    %c0_29 = arith.constant 0 : index
    %c0_30 = arith.constant 0 : index
    %29 = vector.load %arg4[%c0_28, %c0_29, %c0_30] : memref<3x16x16xf32, #tpu.memory_space<vmem>>, vector<1x16x16xf32>
    %30 = vector.shape_cast %29 : vector<1x16x16xf32> to vector<16x16xf32>
    %31 = arith.addf %30, %28 : vector<16x16xf32>
    %c0_31 = arith.constant 0 : index
    %c0_32 = arith.constant 0 : index
    %c0_33 = arith.constant 0 : index
    %32 = vector.load %arg4[%c0_31, %c0_32, %c0_33] : memref<3x16x16xf32, #tpu.memory_space<vmem>>, vector<1x16x16xf32>
    %33 = vector.shape_cast %32 : vector<1x16x16xf32> to vector<16x16xf32>
    %34 = vector.shape_cast %31 : vector<16x16xf32> to vector<1x16x16xf32>
    tpu.vector_store %arg4[%c0_31, %c0_32, %c0_33], %34 {strides = array<i32>} : memref<3x16x16xf32, #tpu.memory_space<vmem>>, vector<1x16x16xf32>,
    %c1_34 = arith.constant 1 : index
    %c1_35 = arith.constant 1 : index
    %c0_36 = arith.constant 0 : index
    %c0_37 = arith.constant 0 : index
    %35 = vector.load %arg2[%c1_34, %c1_35, %c0_36, %c0_37] : memref<3x4x16x1xf32, #tpu.memory_space<vmem>>, vector<1x1x16x1xf32>
    %36 = vector.shape_cast %35 : vector<1x1x16x1xf32> to vector<16x1xf32>
    %37 = vector.broadcast %36 : vector<16x1xf32> to vector<16x16xf32>
    %38 = arith.mulf %24, %37 : vector<16x16xf32>
    %c1_38 = arith.constant 1 : index
    %c0_39 = arith.constant 0 : index
    %c0_40 = arith.constant 0 : index
    %39 = vector.load %arg4[%c1_38, %c0_39, %c0_40] : memref<3x16x16xf32, #tpu.memory_space<vmem>>, vector<1x16x16xf32>
    %40 = vector.shape_cast %39 : vector<1x16x16xf32> to vector<16x16xf32>
    %41 = arith.addf %40, %38 : vector<16x16xf32>
    %c1_41 = arith.constant 1 : index
    %c0_42 = arith.constant 0 : index
    %c0_43 = arith.constant 0 : index
    %42 = vector.load %arg4[%c1_41, %c0_42, %c0_43] : memref<3x16x16xf32, #tpu.memory_space<vmem>>, vector<1x16x16xf32>
    %43 = vector.shape_cast %42 : vector<1x16x16xf32> to vector<16x16xf32>
    %44 = vector.shape_cast %41 : vector<16x16xf32> to vector<1x16x16xf32>
    tpu.vector_store %arg4[%c1_41, %c0_42, %c0_43], %44 {strides = array<i32>} : memref<3x16x16xf32, #tpu.memory_space<vmem>>, vector<1x16x16xf32>,
    %c2_44 = arith.constant 2 : index
    %c1_45 = arith.constant 1 : index
    %c0_46 = arith.constant 0 : index
    %c0_47 = arith.constant 0 : index
    %45 = vector.load %arg2[%c2_44, %c1_45, %c0_46, %c0_47] : memref<3x4x16x1xf32, #tpu.memory_space<vmem>>, vector<1x1x16x1xf32>
    %46 = vector.shape_cast %45 : vector<1x1x16x1xf32> to vector<16x1xf32>
    %47 = vector.broadcast %46 : vector<16x1xf32> to vector<16x16xf32>
    %48 = arith.mulf %24, %47 : vector<16x16xf32>
    %c2_48 = arith.constant 2 : index
    %c0_49 = arith.constant 0 : index
    %c0_50 = arith.constant 0 : index
    %49 = vector.load %arg4[%c2_48, %c0_49, %c0_50] : memref<3x16x16xf32, #tpu.memory_space<vmem>>, vector<1x16x16xf32>
    %50 = vector.shape_cast %49 : vector<1x16x16xf32> to vector<16x16xf32>
    %51 = arith.addf %50, %48 : vector<16x16xf32>
    %c2_51 = arith.constant 2 : index
    %c0_52 = arith.constant 0 : index
    %c0_53 = arith.constant 0 : index
    %52 = vector.load %arg4[%c2_51, %c0_52, %c0_53] : memref<3x16x16xf32, #tpu.memory_space<vmem>>, vector<1x16x16xf32>
    %53 = vector.shape_cast %52 : vector<1x16x16xf32> to vector<16x16xf32>
    %54 = vector.shape_cast %51 : vector<16x16xf32> to vector<1x16x16xf32>
    tpu.vector_store %arg4[%c2_51, %c0_52, %c0_53], %54 {strides = array<i32>} : memref<3x16x16xf32, #tpu.memory_space<vmem>>, vector<1x16x16xf32>,
    %c2_54 = arith.constant 2 : index
    %c0_55 = arith.constant 0 : index
    %c0_56 = arith.constant 0 : index
    %55 = vector.load %arg3[%c2_54, %c0_55, %c0_56] : memref<4x16x16xf32, #tpu.memory_space<vmem>>, vector<1x16x16xf32>
    %56 = vector.shape_cast %55 : vector<1x16x16xf32> to vector<16x16xf32>
    %c0_57 = arith.constant 0 : index
    %c2_58 = arith.constant 2 : index
    %c0_59 = arith.constant 0 : index
    %c0_60 = arith.constant 0 : index
    %57 = vector.load %arg2[%c0_57, %c2_58, %c0_59, %c0_60] : memref<3x4x16x1xf32, #tpu.memory_space<vmem>>, vector<1x1x16x1xf32>
    %58 = vector.shape_cast %57 : vector<1x1x16x1xf32> to vector<16x1xf32>
    %59 = vector.broadcast %58 : vector<16x1xf32> to vector<16x16xf32>
    %60 = arith.mulf %56, %59 : vector<16x16xf32>
    %c0_61 = arith.constant 0 : index
    %c0_62 = arith.constant 0 : index
    %c0_63 = arith.constant 0 : index
    %61 = vector.load %arg4[%c0_61, %c0_62, %c0_63] : memref<3x16x16xf32, #tpu.memory_space<vmem>>, vector<1x16x16xf32>
    %62 = vector.shape_cast %61 : vector<1x16x16xf32> to vector<16x16xf32>
    %63 = arith.addf %62, %60 : vector<16x16xf32>
    %c0_64 = arith.constant 0 : index
    %c0_65 = arith.constant 0 : index
    %c0_66 = arith.constant 0 : index
    %64 = vector.load %arg4[%c0_64, %c0_65, %c0_66] : memref<3x16x16xf32, #tpu.memory_space<vmem>>, vector<1x16x16xf32>
    %65 = vector.shape_cast %64 : vector<1x16x16xf32> to vector<16x16xf32>
    %66 = vector.shape_cast %63 : vector<16x16xf32> to vector<1x16x16xf32>
    tpu.vector_store %arg4[%c0_64, %c0_65, %c0_66], %66 {strides = array<i32>} : memref<3x16x16xf32, #tpu.memory_space<vmem>>, vector<1x16x16xf32>,
    %c1_67 = arith.constant 1 : index
    %c2_68 = arith.constant 2 : index
    %c0_69 = arith.constant 0 : index
    %c0_70 = arith.constant 0 : index
    %67 = vector.load %arg2[%c1_67, %c2_68, %c0_69, %c0_70] : memref<3x4x16x1xf32, #tpu.memory_space<vmem>>, vector<1x1x16x1xf32>
    %68 = vector.shape_cast %67 : vector<1x1x16x1xf32> to vector<16x1xf32>
    %69 = vector.broadcast %68 : vector<16x1xf32> to vector<16x16xf32>
    %70 = arith.mulf %56, %69 : vector<16x16xf32>
    %c1_71 = arith.constant 1 : index
    %c0_72 = arith.constant 0 : index
    %c0_73 = arith.constant 0 : index
    %71 = vector.load %arg4[%c1_71, %c0_72, %c0_73] : memref<3x16x16xf32, #tpu.memory_space<vmem>>, vector<1x16x16xf32>
    %72 = vector.shape_cast %71 : vector<1x16x16xf32> to vector<16x16xf32>
    %73 = arith.addf %72, %70 : vector<16x16xf32>
    %c1_74 = arith.constant 1 : index
    %c0_75 = arith.constant 0 : index
    %c0_76 = arith.constant 0 : index
    %74 = vector.load %arg4[%c1_74, %c0_75, %c0_76] : memref<3x16x16xf32, #tpu.memory_space<vmem>>, vector<1x16x16xf32>
    %75 = vector.shape_cast %74 : vector<1x16x16xf32> to vector<16x16xf32>
    %76 = vector.shape_cast %73 : vector<16x16xf32> to vector<1x16x16xf32>
    tpu.vector_store %arg4[%c1_74, %c0_75, %c0_76], %76 {strides = array<i32>} : memref<3x16x16xf32, #tpu.memory_space<vmem>>, vector<1x16x16xf32>,
    %c2_77 = arith.constant 2 : index
    %c2_78 = arith.constant 2 : index
    %c0_79 = arith.constant 0 : index
    %c0_80 = arith.constant 0 : index
    %77 = vector.load %arg2[%c2_77, %c2_78, %c0_79, %c0_80] : memref<3x4x16x1xf32, #tpu.memory_space<vmem>>, vector<1x1x16x1xf32>
    %78 = vector.shape_cast %77 : vector<1x1x16x1xf32> to vector<16x1xf32>
    %79 = vector.broadcast %78 : vector<16x1xf32> to vector<16x16xf32>
    %80 = arith.mulf %56, %79 : vector<16x16xf32>
    %c2_81 = arith.constant 2 : index
    %c0_82 = arith.constant 0 : index
    %c0_83 = arith.constant 0 : index
    %81 = vector.load %arg4[%c2_81, %c0_82, %c0_83] : memref<3x16x16xf32, #tpu.memory_space<vmem>>, vector<1x16x16xf32>
    %82 = vector.shape_cast %81 : vector<1x16x16xf32> to vector<16x16xf32>
    %83 = arith.addf %82, %80 : vector<16x16xf32>
    %c2_84 = arith.constant 2 : index
    %c0_85 = arith.constant 0 : index
    %c0_86 = arith.constant 0 : index
    %84 = vector.load %arg4[%c2_84, %c0_85, %c0_86] : memref<3x16x16xf32, #tpu.memory_space<vmem>>, vector<1x16x16xf32>
    %85 = vector.shape_cast %84 : vector<1x16x16xf32> to vector<16x16xf32>
    %86 = vector.shape_cast %83 : vector<16x16xf32> to vector<1x16x16xf32>
    tpu.vector_store %arg4[%c2_84, %c0_85, %c0_86], %86 {strides = array<i32>} : memref<3x16x16xf32, #tpu.memory_space<vmem>>, vector<1x16x16xf32>,
    %c3 = arith.constant 3 : index
    %c0_87 = arith.constant 0 : index
    %c0_88 = arith.constant 0 : index
    %87 = vector.load %arg3[%c3, %c0_87, %c0_88] : memref<4x16x16xf32, #tpu.memory_space<vmem>>, vector<1x16x16xf32>
    %88 = vector.shape_cast %87 : vector<1x16x16xf32> to vector<16x16xf32>
    %c0_89 = arith.constant 0 : index
    %c3_90 = arith.constant 3 : index
    %c0_91 = arith.constant 0 : index
    %c0_92 = arith.constant 0 : index
    %89 = vector.load %arg2[%c0_89, %c3_90, %c0_91, %c0_92] : memref<3x4x16x1xf32, #tpu.memory_space<vmem>>, vector<1x1x16x1xf32>
    %90 = vector.shape_cast %89 : vector<1x1x16x1xf32> to vector<16x1xf32>
    %91 = vector.broadcast %90 : vector<16x1xf32> to vector<16x16xf32>
    %92 = arith.mulf %88, %91 : vector<16x16xf32>
    %c0_93 = arith.constant 0 : index
    %c0_94 = arith.constant 0 : index
    %c0_95 = arith.constant 0 : index
    %93 = vector.load %arg4[%c0_93, %c0_94, %c0_95] : memref<3x16x16xf32, #tpu.memory_space<vmem>>, vector<1x16x16xf32>
    %94 = vector.shape_cast %93 : vector<1x16x16xf32> to vector<16x16xf32>
    %95 = arith.addf %94, %92 : vector<16x16xf32>
    %c0_96 = arith.constant 0 : index
    %c0_97 = arith.constant 0 : index
    %c0_98 = arith.constant 0 : index
    %96 = vector.load %arg4[%c0_96, %c0_97, %c0_98] : memref<3x16x16xf32, #tpu.memory_space<vmem>>, vector<1x16x16xf32>
    %97 = vector.shape_cast %96 : vector<1x16x16xf32> to vector<16x16xf32>
    %98 = vector.shape_cast %95 : vector<16x16xf32> to vector<1x16x16xf32>
    tpu.vector_store %arg4[%c0_96, %c0_97, %c0_98], %98 {strides = array<i32>} : memref<3x16x16xf32, #tpu.memory_space<vmem>>, vector<1x16x16xf32>,
    %c1_99 = arith.constant 1 : index
    %c3_100 = arith.constant 3 : index
    %c0_101 = arith.constant 0 : index
    %c0_102 = arith.constant 0 : index
    %99 = vector.load %arg2[%c1_99, %c3_100, %c0_101, %c0_102] : memref<3x4x16x1xf32, #tpu.memory_space<vmem>>, vector<1x1x16x1xf32>
    %100 = vector.shape_cast %99 : vector<1x1x16x1xf32> to vector<16x1xf32>
    %101 = vector.broadcast %100 : vector<16x1xf32> to vector<16x16xf32>
    %102 = arith.mulf %88, %101 : vector<16x16xf32>
    %c1_103 = arith.constant 1 : index
    %c0_104 = arith.constant 0 : index
    %c0_105 = arith.constant 0 : index
    %103 = vector.load %arg4[%c1_103, %c0_104, %c0_105] : memref<3x16x16xf32, #tpu.memory_space<vmem>>, vector<1x16x16xf32>
    %104 = vector.shape_cast %103 : vector<1x16x16xf32> to vector<16x16xf32>
    %105 = arith.addf %104, %102 : vector<16x16xf32>
    %c1_106 = arith.constant 1 : index
    %c0_107 = arith.constant 0 : index
    %c0_108 = arith.constant 0 : index
    %106 = vector.load %arg4[%c1_106, %c0_107, %c0_108] : memref<3x16x16xf32, #tpu.memory_space<vmem>>, vector<1x16x16xf32>
    %107 = vector.shape_cast %106 : vector<1x16x16xf32> to vector<16x16xf32>
    %108 = vector.shape_cast %105 : vector<16x16xf32> to vector<1x16x16xf32>
    tpu.vector_store %arg4[%c1_106, %c0_107, %c0_108], %108 {strides = array<i32>} : memref<3x16x16xf32, #tpu.memory_space<vmem>>, vector<1x16x16xf32>,
    %c2_109 = arith.constant 2 : index
    %c3_110 = arith.constant 3 : index
    %c0_111 = arith.constant 0 : index
    %c0_112 = arith.constant 0 : index
    %109 = vector.load %arg2[%c2_109, %c3_110, %c0_111, %c0_112] : memref<3x4x16x1xf32, #tpu.memory_space<vmem>>, vector<1x1x16x1xf32>
    %110 = vector.shape_cast %109 : vector<1x1x16x1xf32> to vector<16x1xf32>
    %111 = vector.broadcast %110 : vector<16x1xf32> to vector<16x16xf32>
    %112 = arith.mulf %88, %111 : vector<16x16xf32>
    %c2_113 = arith.constant 2 : index
    %c0_114 = arith.constant 0 : index
    %c0_115 = arith.constant 0 : index
    %113 = vector.load %arg4[%c2_113, %c0_114, %c0_115] : memref<3x16x16xf32, #tpu.memory_space<vmem>>, vector<1x16x16xf32>
    %114 = vector.shape_cast %113 : vector<1x16x16xf32> to vector<16x16xf32>
    %115 = arith.addf %114, %112 : vector<16x16xf32>
    %c2_116 = arith.constant 2 : index
    %c0_117 = arith.constant 0 : index
    %c0_118 = arith.constant 0 : index
    %116 = vector.load %arg4[%c2_116, %c0_117, %c0_118] : memref<3x16x16xf32, #tpu.memory_space<vmem>>, vector<1x16x16xf32>
    %117 = vector.shape_cast %116 : vector<1x16x16xf32> to vector<16x16xf32>
    %118 = vector.shape_cast %115 : vector<16x16xf32> to vector<1x16x16xf32>
    tpu.vector_store %arg4[%c2_116, %c0_117, %c0_118], %118 {strides = array<i32>} : memref<3x16x16xf32, #tpu.memory_space<vmem>>, vector<1x16x16xf32>,
    return
  }
  func.func @transform_0(%arg0: i32, %arg1: i32) -> (i32, i32, i32, i32) {
    %c0_i32 = arith.constant 0 : i32
    %c0_i32_0 = arith.constant 0 : i32
    %c0_i32_1 = arith.constant 0 : i32
    %c0_i32_2 = arith.constant 0 : i32
    return %c0_i32, %c0_i32_0, %arg0, %c0_i32_1 : i32, i32, i32, i32
  }
  func.func @transform_1(%arg0: i32, %arg1: i32) -> (i32, i32, i32) {
    %c0_i32 = arith.constant 0 : i32
    %c0_i32_0 = arith.constant 0 : i32
    return %c0_i32, %arg0, %arg1 : i32, i32, i32
  }
  func.func @transform_2(%arg0: i32, %arg1: i32) -> (i32, i32, i32) {
    %c0_i32 = arith.constant 0 : i32
    %c0_i32_0 = arith.constant 0 : i32
    return %c0_i32, %arg0, %arg1 : i32, i32, i32
  }
}

</mosaic_0001>

<bundles_post_ra>
// kernel: tpu_custom_call.1
= control target key start
LH: loop header
LB: loop body
LE: loop exit
PB: predicated region body
PF: predicated region fallthrough
CT: control target
= control target key end

     0   :  { %v339_v2 = vmov 0   ;;  %s490_s0 = inlined_call_operand.vmem [shape: f32[3,4,16,1], index: 0, kind: input, shape index: {}]   ;;  %s491_s1 = inlined_call_operand.vmem [shape: f32[4,16,16], index: 1, kind: input, shape index: {}]   ;;  %s492_s2 = inlined_call_operand.hbm [shape: f32[3,16,16], index: 2, kind: output, shape index: {}]  }
   0x1   :  { %v281_v0 = vld [vmem:[%s490_s0 + $0x40] sm:$0xff]  ;;  %314 = vset.pattern.permute.xlu1 %v339_v2  ;;  %313 = vset.pattern.permute.xlu0 %v339_v2  ;;  %v282_v3 = vld [vmem:[%s490_s0 + $0x48] sm:$0xff] }
   0x2   :  { %v14_v1 = vld [vmem:[%s490_s0] sm:$0xff]  ;;  %36 = vperm.xlu1 %314, %v281_v0   ;;  %v15_v4 = vld [vmem:[%s490_s0 + $0x8] sm:$0xff] }
   0x3   :  { %18 = vperm.xlu0 %313, %v14_v1   ;;  %v284_v5 = vld [vmem:[%s490_s0 + $0x88] sm:$0xff]  ;;  %v283_v6 = vld [vmem:[%s490_s0 + $0x80] sm:$0xff] }
   0x6   :  { %41 = vperm.xlu1 %314, %v282_v3  }
   0x7   :  { %23 = vperm.xlu0 %313, %v15_v4  }
   0x8   :  { %7 = vsyncpa [#allocation3], 0  ;;  %v288_v7 = vld [vmem:[%s490_s0 + $0x18] sm:$0xff]  ;;  %v287_v8 = vld [vmem:[%s490_s0 + $0x10] sm:$0xff]  ;;  %vm28_vm0 = vcmask 130048  }
   0x9   :  { %v290_v9 = vld [vmem:[%s490_s0 + $0x58] sm:$0xff]  ;;  %v289_v10 = vld [vmem:[%s490_s0 + $0x50] sm:$0xff]  ;;  %v296_v13 = vld [vmem:[%s490_s0 + $0x28] sm:$0xff] }
   0xa   :  { %59 = vperm.xlu1 %314, %v284_v5   ;;  %v292_v11 = vld [vmem:[%s490_s0 + $0x98] sm:$0xff]  ;;  %v291_v12 = vld [vmem:[%s490_s0 + $0x90] sm:$0xff]  ;;  %v295_v14 = vld [vmem:[%s490_s0 + $0x20] sm:$0xff] }
   0xb   :  { %54 = vperm.xlu0 %313, %v283_v6   ;;  %v298_v15 = vld [vmem:[%s490_s0 + $0x68] sm:$0xff]  ;;  %v297_v16 = vld [vmem:[%s490_s0 + $0x60] sm:$0xff]  ;;  %v304_v19 = vld [vmem:[%s490_s0 + $0x38] sm:$0xff] }
   0xc   :  { %v300_v17 = vld [vmem:[%s490_s0 + $0xa8] sm:$0xff]  ;;  %v299_v18 = vld [vmem:[%s490_s0 + $0xa0] sm:$0xff]  ;;  %v303_v20 = vld [vmem:[%s490_s0 + $0x30] sm:$0xff] }
   0xd   :  { %v306_v21 = vld [vmem:[%s490_s0 + $0x78] sm:$0xff]  ;;  %v305_v22 = vld [vmem:[%s490_s0 + $0x70] sm:$0xff]  ;;  %v12_v25 = vld [vmem:[%s491_s1] sm:$0xff] }
   0xe   :  { %80 = vperm.xlu1 %314, %v288_v7   ;;  %v308_v23 = vld [vmem:[%s490_s0 + $0xb8] sm:$0xff]  ;;  %v307_v24 = vld [vmem:[%s490_s0 + $0xb0] sm:$0xff]  ;;  %v13_v30 = vld [vmem:[%s491_s1 + $0x8] sm:$0xff] }
   0xf   :  { %75 = vperm.xlu0 %313, %v287_v8   ;;  %v286_v39 = vld [vmem:[%s491_s1 + $0x18] sm:$0xff]  ;;  %v285_v40 = vld [vmem:[%s491_s1 + $0x10] sm:$0xff]  ;;  %v294_v61 = vld [vmem:[%s491_s1 + $0x28] sm:$0xff] }
  0x10   :  { %v293_v0 = vld [vmem:[%s491_s1 + $0x20] sm:$0xff] }
  0x12   :  { %101 = vperm.xlu1 %314, %v290_v9  }
  0x13   :  { %96 = vperm.xlu0 %313, %v289_v10  }
  0x16   :  { %122 = vperm.xlu1 %314, %v292_v11  }
  0x17   :  { %117 = vperm.xlu0 %313, %v291_v12  }
  0x1a   :  { %146 = vperm.xlu1 %314, %v296_v13  }
  0x1b   :  { %141 = vperm.xlu0 %313, %v295_v14  }
  0x1e   :  { %167 = vperm.xlu1 %314, %v298_v15  }
  0x1f   :  { %162 = vperm.xlu0 %313, %v297_v16  }
  0x22   :  { %188 = vperm.xlu1 %314, %v300_v17  }
  0x23   :  { %183 = vperm.xlu0 %313, %v299_v18  }
  0x26   :  { %212 = vperm.xlu1 %314, %v304_v19  }
  0x27   :  { %207 = vperm.xlu0 %313, %v303_v20  }
  0x2a   :  { %233 = vperm.xlu1 %314, %v306_v21  }
  0x2b   :  { %228 = vperm.xlu0 %313, %v305_v22  }
  0x2e   :  { %254 = vperm.xlu1 %314, %v308_v23   ;;  %v302_v23 = vld [vmem:[%s491_s1 + $0x38] sm:$0xff] }
  0x2f   :  { %249 = vperm.xlu0 %313, %v307_v24  }
  0x81   :  { %v37_v26 = vpop.permute.xlu1 %36 }
  0x82   :  { %v19_v27 = vpop.permute.xlu0 %18  ;;  %v44_v28 = vmul.f32 %v37_v26, %v12_v25  ;;  %v301_v26 = vld [vmem:[%s491_s1 + $0x30] sm:$0xff]  ;;  %s340_s1 = smov [#allocation2]  }
  0x83   :  { %v26_v29 = vmul.f32 %v19_v27, %v12_v25  ;;  %s270_s16 = sshll.u32 %s340_s1, 4  ;;  %s271_s16 = int_to_ptr.vmem [resolvable:$true] %s270_s16 }
  0x84   :  { %47 = vst.msk [vmem:[#allocation2 + $0x10] sm:$0xff] %vm28_vm0, %v44_v28  ;;  %s315_s17 = scalar_lea.vmem %s271_s16, 768  ;;  %p320_p1 = scmp.lt.s32.totalorder %s271_s16, %s271_s16 }
  0x85   :  { %29 = vst.msk [vmem:[#allocation2] sm:$0xff] %vm28_vm0, %v26_v29  ;;  %v42_v31 = vpop.permute.xlu1 %41  ;;  %p316_p0 = scmp.ne.s32.totalorder %s271_s16, %s315_s17  ;;  %p321_p2 = scmp.lt.s32.totalorder %s315_s17, %s315_s17 }
  0x86   :  { %v24_v32 = vpop.permute.xlu0 %23  ;;  %v45_v33 = vmul.f32 %v42_v31, %v13_v30 }
  0x87   :  { %v27_v34 = vmul.f32 %v24_v32, %v13_v30  ;;  %p322_p3 = por %p321_p2, %p320_p1 }
  0x88   :  { %48 = vst.msk [vmem:[#allocation2 + $0x18] sm:$0xff] %vm28_vm0, %v45_v33 }
  0x89   :  { %30 = vst.msk [vmem:[#allocation2 + $0x8] sm:$0xff] %vm28_vm0, %v27_v34  ;;  %v60_v35 = vpop.permute.xlu1 %59  ;;  %p323_p4 = pnand %p322_p3, %p316_p0 }
  0x8a   :  { %v55_v36 = vpop.permute.xlu0 %54  ;;  %v63_v37 = vmul.f32 %v60_v35, %v13_v30 }
  0x8b   :  { %v62_v38 = vmul.f32 %v55_v36, %v12_v25  ;;  %v106_v54 = vld [vmem:[#allocation2 + $0x10] sm:$0xff] }
  0x8c   :  { %66 = vst.msk [vmem:[#allocation2 + $0x28] sm:$0xff] %vm28_vm0, %v63_v37  ;;  %v85_v46 = vld [vmem:[#allocation2] sm:$0xff] }
  0x8d   :  { %65 = vst.msk [vmem:[#allocation2 + $0x20] sm:$0xff] %vm28_vm0, %v62_v38  ;;  %v81_v41 = vpop.permute.xlu1 %80 }
  0x8e   :  { %v76_v42 = vpop.permute.xlu0 %75  ;;  %v84_v43 = vmul.f32 %v286_v39, %v81_v41 }
  0x8f   :  { %v83_v44 = vmul.f32 %v285_v40, %v76_v42  ;;  %v107_v53 = vld [vmem:[#allocation2 + $0x18] sm:$0xff] }
  0x90   :  { %v86_v45 = vld [vmem:[#allocation2 + $0x8] sm:$0xff] }
  0x91   :  { %v88_v47 = vadd.f32 %v86_v45, %v84_v43  ;;  %v87_v48 = vadd.f32 %v85_v46, %v83_v44  ;;  %v102_v49 = vpop.permute.xlu1 %101 }
  0x92   :  { %v97_v50 = vpop.permute.xlu0 %96  ;;  %v105_v51 = vmul.f32 %v286_v39, %v102_v49 }
  0x93   :  { %90 = vst.msk [vmem:[#allocation2 + $0x8] sm:$0xff] %vm28_vm0, %v88_v47  ;;  %89 = vst.msk [vmem:[#allocation2] sm:$0xff] %vm28_vm0, %v87_v48  ;;  %v104_v52 = vmul.f32 %v285_v40, %v97_v50  ;;  %v128_v62 = vld [vmem:[#allocation2 + $0x28] sm:$0xff] }
  0x94   :  { %v109_v55 = vadd.f32 %v107_v53, %v105_v51  ;;  %v127_v63 = vld [vmem:[#allocation2 + $0x20] sm:$0xff] }
  0x95   :  { %v108_v56 = vadd.f32 %v106_v54, %v104_v52  ;;  %v123_v57 = vpop.permute.xlu1 %122 }
  0x96   :  { %v118_v58 = vpop.permute.xlu0 %117  ;;  %111 = vst.msk [vmem:[#allocation2 + $0x18] sm:$0xff] %vm28_vm0, %v109_v55  ;;  %v126_v59 = vmul.f32 %v286_v39, %v123_v57 }
  0x97   :  { %110 = vst.msk [vmem:[#allocation2 + $0x10] sm:$0xff] %vm28_vm0, %v108_v56  ;;  %v125_v60 = vmul.f32 %v285_v40, %v118_v58 }
  0x98   :  { %v130_v1 = vadd.f32 %v128_v62, %v126_v59 }
  0x99   :  { %v129_v2 = vadd.f32 %v127_v63, %v125_v60  ;;  %v147_v3 = vpop.permute.xlu1 %146 }
  0x9a   :  { %v142_v4 = vpop.permute.xlu0 %141  ;;  %132 = vst.msk [vmem:[#allocation2 + $0x28] sm:$0xff] %vm28_vm0, %v130_v1  ;;  %v150_v5 = vmul.f32 %v294_v61, %v147_v3  ;;  %v152_v7 = vld [vmem:[#allocation2 + $0x8] sm:$0xff]  ;;  %v151_v8 = vld [vmem:[#allocation2] sm:$0xff] }
  0x9b   :  { %131 = vst.msk [vmem:[#allocation2 + $0x20] sm:$0xff] %vm28_vm0, %v129_v2  ;;  %v149_v6 = vmul.f32 %v293_v0, %v142_v4 }
  0x9c   :  { %v154_v9 = vadd.f32 %v152_v7, %v150_v5 }
  0x9d   :  { %v153_v10 = vadd.f32 %v151_v8, %v149_v6  ;;  %v168_v11 = vpop.permute.xlu1 %167  ;;  %v173_v15 = vld [vmem:[#allocation2 + $0x18] sm:$0xff] }
  0x9e   :  { %v163_v12 = vpop.permute.xlu0 %162  ;;  %156 = vst.msk [vmem:[#allocation2 + $0x8] sm:$0xff] %vm28_vm0, %v154_v9  ;;  %v171_v13 = vmul.f32 %v294_v61, %v168_v11  ;;  %v172_v16 = vld [vmem:[#allocation2 + $0x10] sm:$0xff] }
  0x9f   :  { %155 = vst.msk [vmem:[#allocation2] sm:$0xff] %vm28_vm0, %v153_v10  ;;  %v170_v14 = vmul.f32 %v293_v0, %v163_v12 }
  0xa0   :  { %v175_v17 = vadd.f32 %v173_v15, %v171_v13 }
  0xa1   :  { %v174_v18 = vadd.f32 %v172_v16, %v170_v14  ;;  %v189_v19 = vpop.permute.xlu1 %188  ;;  %v194_v24 = vld [vmem:[#allocation2 + $0x28] sm:$0xff] }
  0xa2   :  { %v184_v20 = vpop.permute.xlu0 %183  ;;  %177 = vst.msk [vmem:[#allocation2 + $0x18] sm:$0xff] %vm28_vm0, %v175_v17  ;;  %v192_v21 = vmul.f32 %v294_v61, %v189_v19  ;;  %v193_v25 = vld [vmem:[#allocation2 + $0x20] sm:$0xff] }
  0xa3   :  { %176 = vst.msk [vmem:[#allocation2 + $0x10] sm:$0xff] %vm28_vm0, %v174_v18  ;;  %v191_v22 = vmul.f32 %v293_v0, %v184_v20 }
  0xa4   :  { %v196_v27 = vadd.f32 %v194_v24, %v192_v21 }
  0xa5   :  { %v195_v28 = vadd.f32 %v193_v25, %v191_v22  ;;  %v213_v29 = vpop.permute.xlu1 %212  ;;  %v218_v33 = vld [vmem:[#allocation2 + $0x8] sm:$0xff] }
  0xa6   :  { %v208_v30 = vpop.permute.xlu0 %207  ;;  %198 = vst.msk [vmem:[#allocation2 + $0x28] sm:$0xff] %vm28_vm0, %v196_v27  ;;  %v216_v31 = vmul.f32 %v302_v23, %v213_v29  ;;  %v217_v34 = vld [vmem:[#allocation2] sm:$0xff] }
  0xa7   :  { %197 = vst.msk [vmem:[#allocation2 + $0x20] sm:$0xff] %vm28_vm0, %v195_v28  ;;  %v215_v32 = vmul.f32 %v301_v26, %v208_v30 }
  0xa8   :  { %v220_v35 = vadd.f32 %v218_v33, %v216_v31 }
  0xa9   :  { %v219_v36 = vadd.f32 %v217_v34, %v215_v32  ;;  %v234_v37 = vpop.permute.xlu1 %233  ;;  %v239_v41 = vld [vmem:[#allocation2 + $0x18] sm:$0xff] }
  0xaa   :  { %v229_v38 = vpop.permute.xlu0 %228  ;;  %222 = vst.msk [vmem:[#allocation2 + $0x8] sm:$0xff] %vm28_vm0, %v220_v35  ;;  %v237_v39 = vmul.f32 %v302_v23, %v234_v37  ;;  %v238_v42 = vld [vmem:[#allocation2 + $0x10] sm:$0xff] }
  0xab   :  { %221 = vst.msk [vmem:[#allocation2] sm:$0xff] %vm28_vm0, %v219_v36  ;;  %v236_v40 = vmul.f32 %v301_v26, %v229_v38 }
  0xac   :  { %v241_v43 = vadd.f32 %v239_v41, %v237_v39 }
  0xad   :  { %v240_v44 = vadd.f32 %v238_v42, %v236_v40  ;;  %v255_v45 = vpop.permute.xlu1 %254  ;;  %v260_v49 = vld [vmem:[#allocation2 + $0x28] sm:$0xff] }
  0xae   :  { %v250_v46 = vpop.permute.xlu0 %249  ;;  %243 = vst.msk [vmem:[#allocation2 + $0x18] sm:$0xff] %vm28_vm0, %v241_v43  ;;  %v258_v47 = vmul.f32 %v302_v23, %v255_v45  ;;  %v259_v50 = vld [vmem:[#allocation2 + $0x20] sm:$0xff] }
  0xaf   :  { %242 = vst.msk [vmem:[#allocation2 + $0x10] sm:$0xff] %vm28_vm0, %v240_v44  ;;  %v257_v48 = vmul.f32 %v301_v26, %v250_v46 }
  0xb0   :  { %v262_v51 = vadd.f32 %v260_v49, %v258_v47 }
  0xb1   :  { %v261_v52 = vadd.f32 %v259_v50, %v257_v48 }
  0xb2   :  { %264 = vst.msk [vmem:[#allocation2 + $0x28] sm:$0xff] %vm28_vm0, %v262_v51 }
  0xb3   :  { %263 = vst.msk [vmem:[#allocation2 + $0x20] sm:$0xff] %vm28_vm0, %v261_v52 }
  0xb4   :  { %326 = shalt.err (!%p323_p4)
}
  0xb5   :  { %s327_s20 = scalar_lea.hbm %s492_s2, 768 }
  0xb6   :  { %p328_p5 = scmp.ne.s32.totalorder %s492_s2, %s327_s20  ;;  %p331_p6 = scmp.lt.u32.totalorder %s327_s20, %s492_s2 }
  0xb8   :  { %p333_p7 = pnand %p331_p6, %p328_p5 }
  0xba   :  { %336 = shalt.err (!%p333_p7)
}
  0xbb   :  { %s341_s25 = smov 128   ;;  %s342_s26 = smov 8  }
  0xbc   :  { %276 = dma.vmem_to_hbm [thread:$0]  %s271_s16, 768, %s492_s2, [#allocation3], %s341_s25, %s341_s25, %s342_s26  }
  0xbd   :  { %337 = dma.done.wait [#allocation3], 768  }
  0xbe   :  { %338 = vsyncadd [#allocation3], 4294966528 }
  0xbf   :  { %280 = vsyncpa [#allocation3], 1 }

</bundles_post_ra>
